<compile_context>
chip_gen: v6e
topology: v6e:2x2x1
jax: 0.10.0
libtpu: 0.0.40
codegen_flags: <defaults>
</compile_context>

<pallas_src>
import functools

import jax
import jax.numpy as jnp
from jax import lax
from jax.experimental import pallas as pl
from jax.experimental.pallas import tpu as pltpu


_VMEM_LIMIT_BYTES = 32 * 1024 * 1024  # safe scoped limit on v5e/v6e/v7x


def _pick_tile(dim, preferred=(512, 256, 128)):
    """Return (tile, padded_dim).

    Largest preferred tile dividing `dim`; small dims take the full extent;
    large non-divisible dims are padded up to a 256-multiple (v6e/v7x MXU
    friendly) so per-block VMEM stays bounded and the pipeline stays fed.
    """
    for t in preferred:
        if dim >= t and dim % t == 0:
            return t, dim
    if dim <= preferred[0]:
        return dim, dim
    padded = ((dim + 255) // 256) * 256
    return 256, padded


def _pick_seq_tile(dim, preferred=(256, 128)):
    for t in preferred:
        if dim >= t and dim % t == 0:
            return t
    # TODO(synk): pad + mask tail KV blocks for long sequences that are not a
    # multiple of 128; such shapes currently fall back to a single full-S block.
    return dim


# ----------------------- tiled linear: x @ W + b --------------------------- #

def _linear_kernel(x_ref, w_ref, b_ref, o_ref, acc_ref):
    k = pl.program_id(2)

    @pl.when(k == 0)
    def _init():
        acc_ref[...] = jnp.zeros_like(acc_ref)

    # bf16 inputs, f32 accumulation on the MXU.
    acc_ref[...] += jnp.dot(x_ref[...], w_ref[...],
                            preferred_element_type=jnp.float32)

    @pl.when(k == pl.num_programs(2) - 1)
    def _finalize():
        o_ref[...] = (acc_ref[...] + b_ref[...]).astype(o_ref.dtype)


def pallas_linear(x, w, b, out_dtype=None):
    """x: (M, K) @ w: (K, N) + b: (N,) -> (M, N), tiled over (M, N, K)."""
    M, K = x.shape
    N = w.shape[1]
    out_dtype = out_dtype or x.dtype

    tm, Mp = _pick_tile(M)
    tn, Np = _pick_tile(N)
    tk, Kp = _pick_tile(K)
    if (Mp, Kp) != (M, K):
        x = jnp.pad(x, ((0, Mp - M), (0, Kp - K)))
    if (Kp, Np) != (K, N):
        w = jnp.pad(w, ((0, Kp - K), (0, Np - N)))
    if Np != N:
        b = jnp.pad(b, (0, Np - N))

    grid = (Mp // tm, Np // tn, Kp // tk)
    out_isz = jnp.dtype(out_dtype).itemsize
    cost = pl.CostEstimate(
        flops=2 * Mp * Np * Kp + Mp * Np,
        transcendentals=0,
        bytes_accessed=(x.dtype.itemsize * Mp * Kp + w.dtype.itemsize * Kp * Np
                        + 4 * Np + out_isz * Mp * Np),
    )

    out = pl.pallas_call(
        _linear_kernel,
        out_shape=jax.ShapeDtypeStruct((Mp, Np), out_dtype),
        grid_spec=pltpu.PrefetchScalarGridSpec(
            num_scalar_prefetch=0,
            grid=grid,
            in_specs=[
                pl.BlockSpec((tm, tk), lambda i, j, k: (i, k)),
                pl.BlockSpec((tk, tn), lambda i, j, k: (k, j)),
                pl.BlockSpec((1, tn), lambda i, j, k: (0, j)),
            ],
            out_specs=pl.BlockSpec((tm, tn), lambda i, j, k: (i, j)),
            scratch_shapes=[pltpu.VMEM((tm, tn), jnp.float32)],
        ),
        compiler_params=pltpu.CompilerParams(
            dimension_semantics=("parallel", "parallel", "arbitrary"),
            vmem_limit_bytes=_VMEM_LIMIT_BYTES,
        ),
        cost_estimate=cost,
    )(x, w, b.reshape(1, Np))

    if (Mp, Np) != (M, N):
        out = out[:M, :N]
    return out


# --------------- multi-query attention: flash-style online softmax --------- #

def _mqa_flash_kernel(q_ref, kv_ref, o_ref, q_sc, m_sc, l_sc, acc_sc, *,
                      num_heads, head_dim, scale):
    kvi = pl.program_id(2)
    nh, hd = num_heads, head_dim
    tq = q_ref.shape[1]

    @pl.when(kvi == 0)
    def _init():
        # Head regrouping in VMEM (replaces the XLA-side Q transpose): rows of
        # q_sc are (head-major, query) so a single MXU call covers all heads.
        # 1/sqrt(hd) is folded into Q once per (batch, q-tile).
        qb = (q_ref[0] * scale).astype(q_sc.dtype)          # (tq, nh*hd)
        for h in range(nh):                                  # static unroll
            q_sc[h * tq:(h + 1) * tq, :] = qb[:, h * hd:(h + 1) * hd]
        m_sc[...] = jnp.full_like(m_sc, -jnp.inf)
        l_sc[...] = jnp.zeros_like(l_sc)
        acc_sc[...] = jnp.zeros_like(acc_sc)

    kv = kv_ref[0]                        # (tkv, 2*hd): shared MQA KV head
    k = kv[:, :hd]
    v = kv[:, hd:]

    # (nh*tq, hd) x (tkv, hd)^T -> (nh*tq, tkv) f32 scores; no explicit k.T.
    s = lax.dot_general(q_sc[...], k, (((1,), (1,)), ((), ())),
                        preferred_element_type=jnp.float32)

    # Online softmax (f32 math: v5e VPU/EUP have no bf16).
    m_prev = m_sc[...]
    m_new = jnp.maximum(m_prev, jnp.max(s, axis=-1, keepdims=True))
    alpha = jnp.exp(m_prev - m_new)
    p = jnp.exp(s - m_new)
    l_sc[...] = alpha * l_sc[...] + jnp.sum(p, axis=-1, keepdims=True)
    acc_sc[...] = alpha * acc_sc[...] + jnp.dot(
        p.astype(kv.dtype), v, preferred_element_type=jnp.float32)
    m_sc[...] = m_new

    @pl.when(kvi == pl.num_programs(2) - 1)
    def _finalize():
        ctx = acc_sc[...] * pl.reciprocal(l_sc[...], approx=True)   # (nh*tq, hd)
        # Emit the PyTorch output.transpose(-1,-2) layout (nh, hd, tq) directly
        # so the downstream .view(B, S, H) is a free reshape outside.  Lane dim
        # is tq -> lane-dense whenever the q-tile is a 128-multiple.
        o_ref[0] = jnp.swapaxes(ctx.reshape(nh, tq, hd), -1, -2).astype(o_ref.dtype)


def pallas_mqa_attention(q, kv, num_heads):
    """q: (B, S, H); kv: (B, S, 2*hd) -> PyTorch-transposed context (B, nh, hd, S)."""
    B, S, H = q.shape
    nh = num_heads
    hd = H // nh
    tq = _pick_seq_tile(S, preferred=(128,))        # keeps f32 score block small
    tkv = _pick_seq_tile(S, preferred=(256, 128))
    grid = (B, S // tq, S // tkv)                   # B*nQ parallel points (v7x 2 TCs)

    kern = functools.partial(_mqa_flash_kernel, num_heads=nh, head_dim=hd,
                             scale=1.0 / (float(hd) ** 0.5))
    cost = pl.CostEstimate(
        flops=B * nh * S * S * (4 * hd + 4),
        transcendentals=B * nh * S * S,
        bytes_accessed=q.dtype.itemsize * B * S * H * 2
                       + kv.dtype.itemsize * B * S * 2 * hd,
    )

    return pl.pallas_call(
        kern,
        out_shape=jax.ShapeDtypeStruct((B, nh, hd, S), q.dtype),
        grid_spec=pltpu.PrefetchScalarGridSpec(
            num_scalar_prefetch=0,
            grid=grid,
            in_specs=[
                pl.BlockSpec((1, tq, H), lambda b, qi, ki: (b, qi, 0)),
                pl.BlockSpec((1, tkv, 2 * hd), lambda b, qi, ki: (b, ki, 0)),
            ],
            out_specs=pl.BlockSpec((1, nh, hd, tq), lambda b, qi, ki: (b, 0, 0, qi)),
            scratch_shapes=[
                pltpu.VMEM((nh * tq, hd), jnp.bfloat16),   # regrouped, scaled Q
                pltpu.VMEM((nh * tq, 1), jnp.float32),     # running max
                pltpu.VMEM((nh * tq, 1), jnp.float32),     # running denominator
                pltpu.VMEM((nh * tq, hd), jnp.float32),    # running context acc
            ],
        ),
        compiler_params=pltpu.CompilerParams(
            dimension_semantics=("parallel", "parallel", "arbitrary"),
            vmem_limit_bytes=_VMEM_LIMIT_BYTES,
        ),
        cost_estimate=cost,
    )(q, kv)


# ------------------------------ Forward pass ------------------------------- #

def prepare_params(params):
    """One-time prep (outside the per-step forward): bf16 weight casts + K|V fusion."""
    return {
        "wq": params["wq"].astype(jnp.bfloat16),
        "bq": params["bq"],
        "wkv": jnp.concatenate([params["wk"], params["wv"]], axis=1).astype(jnp.bfloat16),
        "bkv": jnp.concatenate([params["bk"], params["bv"]], axis=0),
        "wo": params["wo"].astype(jnp.bfloat16),
        "bo": params["bo"],
    }


@functools.partial(jax.jit, static_argnums=(2,))
def multi_query_attention_forward(prepared, hidden_state, num_heads):
    B, S, H = hidden_state.shape
    hd = H // num_heads

    x2 = hidden_state.reshape(B * S, H).astype(jnp.bfloat16)

    # Q projection writes exactly the (B*S, H) layout the attention kernel
    # consumes (no XLA transpose); K|V share one small fused matmul.
    q = pallas_linear(x2, prepared["wq"], prepared["bq"], out_dtype=jnp.bfloat16)
    kv = pallas_linear(x2, prepared["wkv"], prepared["bkv"], out_dtype=jnp.bfloat16)

    ctx_t = pallas_mqa_attention(q.reshape(B, S, H), kv.reshape(B, S, 2 * hd),
                                 num_heads)                       # (B, nh, hd, S)
    # PyTorch: output.transpose(-1,-2).contiguous().view(B, -1, hd*nh).
    # The kernel already emitted (B, nh, hd, S), so this is a free reshape.
    out2 = ctx_t.reshape(B * S, H)
    y = pallas_linear(out2, prepared["wo"], prepared["bo"], out_dtype=jnp.float32)
    return y.reshape(B, S, H)


# Pure-JAX f32 reference with identical semantics (verification only).
def reference_forward(params, hidden_state, num_heads):
    B, S, H = hidden_state.shape
    hd = H // num_heads
    q = hidden_state @ params["wq"] + params["bq"]
    k = hidden_state @ params["wk"] + params["bk"]
    v = hidden_state @ params["wv"] + params["bv"]
    q = q.reshape(B, S, num_heads, hd).transpose(0, 2, 1, 3)
    k = k.reshape(B, S, 1, hd).transpose(0, 2, 1, 3)
    v = v.reshape(B, S, 1, hd).transpose(0, 2, 1, 3)
    score = jnp.einsum("bhqd,bxkd->bhqk", q, k) / jnp.sqrt(jnp.float32(hd))
    probs = jax.nn.softmax(score, axis=-1)
    ctx = jnp.einsum("bhqk,bxkd->bhqd", probs, v)
    out = jnp.swapaxes(ctx, -1, -2).reshape(B, -1, hd * num_heads)
    return out @ params["wo"] + params["bo"]


# --------------------------------- Driver ---------------------------------- #

def init_params(key, hidden_size, num_heads):
    hd = hidden_size // num_heads
    ks = jax.random.split(key, 8)
    scale = 0.05
    return {
        "wq": scale * jax.random.normal(ks[0], (hidden_size, hidden_size), jnp.float32),
        "bq": scale * jax.random.normal(ks[1], (hidden_size,), jnp.float32),
        "wk": scale * jax.random.normal(ks[2], (hidden_size, hd), jnp.float32),
        "bk": scale * jax.random.normal(ks[3], (hd,), jnp.float32),
        "wv": scale * jax.random.normal(ks[4], (hidden_size, hd), jnp.float32),
        "bv": scale * jax.random.normal(ks[5], (hd,), jnp.float32),
        "wo": scale * jax.random.normal(ks[6], (hidden_size, hidden_size), jnp.float32),
        "bo": scale * jax.random.normal(ks[7], (hidden_size,), jnp.float32),
    }


if __name__ == "__main__":
    B, S, H, NUM_HEADS = 2, 8, 32, 4

    root = jax.random.PRNGKey(0)
    pkey, xkey = jax.random.split(root)
    params = init_params(pkey, H, NUM_HEADS)
    hidden_state = jax.random.normal(xkey, (B, S, H), jnp.float32)

    prepared = prepare_params(params)     # hoisted: runs once, not per forward
    y = multi_query_attention_forward(prepared, hidden_state, NUM_HEADS)
    y = jax.block_until_ready(y)

    y_ref = reference_forward(params, hidden_state, NUM_HEADS)
    assert y.shape == (B, S, H)
    # bf16 MXU inputs + approximate softmax reciprocal -> relaxed tolerance vs
    # the f32 reference (observed error ~1e-3 at these magnitudes).
    err = float(jnp.max(jnp.abs(y - y_ref)))
    assert jnp.allclose(y, y_ref, atol=2e-2, rtol=2e-2), f"kernel mismatch, max abs err={err}"

    print("KERNEL_OK")
</pallas_src>

<mosaic_0001>
module attributes {stable_mosaic.version = 11 : i64} {
  func.func @_linear_kernel(%arg0: i32, %arg1: i32, %arg2: i32, %arg3: memref<16x32xbf16, #tpu.memory_space<vmem>>, %arg4: memref<32x32xbf16, #tpu.memory_space<vmem>>, %arg5: memref<1x32xf32, #tpu.memory_space<vmem>>, %arg6: memref<16x32xbf16, #tpu.memory_space<vmem>>, %arg7: memref<16x32xf32, #tpu.memory_space<vmem>>) attributes {dimension_semantics = [#tpu.dimension_semantics<parallel>, #tpu.dimension_semantics<parallel>, #tpu.dimension_semantics<arbitrary>], iteration_bounds = array<i64: 1, 1, 1>, scalar_prefetch = 0 : i64, scratch_operands = 1 : i64, tpu.core_type = #tpu.core_type<tc>, window_params = [{transform_indices = @transform_0, window_bounds = array<i64: 16, 32>}, {transform_indices = @transform_1, window_bounds = array<i64: 32, 32>}, {transform_indices = @transform_2, window_bounds = array<i64: 1, 32>}, {transform_indices = @transform_3, window_bounds = array<i64: 16, 32>}]} {
    %c0_i32 = arith.constant 0 : i32
    %0 = arith.cmpi eq, %arg2, %c0_i32 : i32
    %1 = arith.extui %0 : i1 to i32
    %c0_i32_0 = arith.constant 0 : i32
    %2 = arith.cmpi ne, %1, %c0_i32_0 : i32
    scf.if %2 {
      %cst_10 = arith.constant 0.000000e+00 : f32
      %12 = vector.broadcast %cst_10 : f32 to vector<16x32xf32>
      %c0_11 = arith.constant 0 : index
      %c0_12 = arith.constant 0 : index
      %13 = vector.load %arg7[%c0_11, %c0_12] : memref<16x32xf32, #tpu.memory_space<vmem>>, vector<16x32xf32>
      tpu.vector_store %arg7[%c0_11, %c0_12], %12 {strides = array<i32>} : memref<16x32xf32, #tpu.memory_space<vmem>>, vector<16x32xf32>,
    } else {
    }
    %c0 = arith.constant 0 : index
    %c0_1 = arith.constant 0 : index
    %3 = vector.load %arg7[%c0, %c0_1] : memref<16x32xf32, #tpu.memory_space<vmem>>, vector<16x32xf32>
    %c0_2 = arith.constant 0 : index
    %c0_3 = arith.constant 0 : index
    %4 = vector.load %arg3[%c0_2, %c0_3] : memref<16x32xbf16, #tpu.memory_space<vmem>>, vector<16x32xbf16>
    %c0_4 = arith.constant 0 : index
    %c0_5 = arith.constant 0 : index
    %5 = vector.load %arg4[%c0_4, %c0_5] : memref<32x32xbf16, #tpu.memory_space<vmem>>, vector<32x32xbf16>
    %cst = arith.constant dense<0.000000e+00> : vector<16x32xf32>
    %6 = tpu.matmul %4, %5, %cst {dimension_numbers = #tpu.dot_dimension_numbers<[1], [0], [0], [1], [0, 0, 1, 1], [], []>} : vector<16x32xbf16>, vector<32x32xbf16>, vector<16x32xf32> -> vector<16x32xf32>
    %7 = arith.addf %3, %6 : vector<16x32xf32>
    %c0_6 = arith.constant 0 : index
    %c0_7 = arith.constant 0 : index
    %8 = vector.load %arg7[%c0_6, %c0_7] : memref<16x32xf32, #tpu.memory_space<vmem>>, vector<16x32xf32>
    tpu.vector_store %arg7[%c0_6, %c0_7], %7 {strides = array<i32>} : memref<16x32xf32, #tpu.memory_space<vmem>>, vector<16x32xf32>,
    %c0_i32_8 = arith.constant 0 : i32
    %9 = arith.cmpi eq, %arg2, %c0_i32_8 : i32
    %10 = arith.extui %9 : i1 to i32
    %c0_i32_9 = arith.constant 0 : i32
    %11 = arith.cmpi ne, %10, %c0_i32_9 : i32
    scf.if %11 {
      %c0_10 = arith.constant 0 : index
      %c0_11 = arith.constant 0 : index
      %12 = vector.load %arg7[%c0_10, %c0_11] : memref<16x32xf32, #tpu.memory_space<vmem>>, vector<16x32xf32>
      %c0_12 = arith.constant 0 : index
      %c0_13 = arith.constant 0 : index
      %13 = vector.load %arg5[%c0_12, %c0_13] : memref<1x32xf32, #tpu.memory_space<vmem>>, vector<1x32xf32>
      %14 = vector.broadcast %13 : vector<1x32xf32> to vector<16x32xf32>
      %15 = arith.addf %12, %14 : vector<16x32xf32>
      %16 = arith.truncf %15 : vector<16x32xf32> to vector<16x32xbf16>
      %c0_14 = arith.constant 0 : index
      %c0_15 = arith.constant 0 : index
      %17 = vector.load %arg6[%c0_14, %c0_15] : memref<16x32xbf16, #tpu.memory_space<vmem>>, vector<16x32xbf16>
      tpu.vector_store %arg6[%c0_14, %c0_15], %16 {strides = array<i32>} : memref<16x32xbf16, #tpu.memory_space<vmem>>, vector<16x32xbf16>,
    } else {
    }
    return
  }
  func.func @transform_0(%arg0: i32, %arg1: i32, %arg2: i32) -> (i32, i32) {
    %c0_i32 = arith.constant 0 : i32
    return %arg0, %arg2 : i32, i32
  }
  func.func @transform_1(%arg0: i32, %arg1: i32, %arg2: i32) -> (i32, i32) {
    %c0_i32 = arith.constant 0 : i32
    return %arg2, %arg1 : i32, i32
  }
  func.func @transform_2(%arg0: i32, %arg1: i32, %arg2: i32) -> (i32, i32) {
    %c0_i32 = arith.constant 0 : i32
    %c0_i32_0 = arith.constant 0 : i32
    return %c0_i32, %arg1 : i32, i32
  }
  func.func @transform_3(%arg0: i32, %arg1: i32, %arg2: i32) -> (i32, i32) {
    %c0_i32 = arith.constant 0 : i32
    return %arg0, %arg1 : i32, i32
  }
}

module attributes {stable_mosaic.version = 11 : i64} {
  func.func @_linear_kernel(%arg0: i32, %arg1: i32, %arg2: i32, %arg3: memref<16x32xbf16, #tpu.memory_space<vmem>>, %arg4: memref<32x16xbf16, #tpu.memory_space<vmem>>, %arg5: memref<1x16xf32, #tpu.memory_space<vmem>>, %arg6: memref<16x16xbf16, #tpu.memory_space<vmem>>, %arg7: memref<16x16xf32, #tpu.memory_space<vmem>>) attributes {dimension_semantics = [#tpu.dimension_semantics<parallel>, #tpu.dimension_semantics<parallel>, #tpu.dimension_semantics<arbitrary>], iteration_bounds = array<i64: 1, 1, 1>, scalar_prefetch = 0 : i64, scratch_operands = 1 : i64, tpu.core_type = #tpu.core_type<tc>, window_params = [{transform_indices = @transform_0, window_bounds = array<i64: 16, 32>}, {transform_indices = @transform_1, window_bounds = array<i64: 32, 16>}, {transform_indices = @transform_2, window_bounds = array<i64: 1, 16>}, {transform_indices = @transform_3, window_bounds = array<i64: 16, 16>}]} {
    %c0_i32 = arith.constant 0 : i32
    %0 = arith.cmpi eq, %arg2, %c0_i32 : i32
    %1 = arith.extui %0 : i1 to i32
    %c0_i32_0 = arith.constant 0 : i32
    %2 = arith.cmpi ne, %1, %c0_i32_0 : i32
    scf.if %2 {
      %cst_10 = arith.constant 0.000000e+00 : f32
      %12 = vector.broadcast %cst_10 : f32 to vector<16x16xf32>
      %c0_11 = arith.constant 0 : index
      %c0_12 = arith.constant 0 : index
      %13 = vector.load %arg7[%c0_11, %c0_12] : memref<16x16xf32, #tpu.memory_space<vmem>>, vector<16x16xf32>
      tpu.vector_store %arg7[%c0_11, %c0_12], %12 {strides = array<i32>} : memref<16x16xf32, #tpu.memory_space<vmem>>, vector<16x16xf32>,
    } else {
    }
    %c0 = arith.constant 0 : index
    %c0_1 = arith.constant 0 : index
    %3 = vector.load %arg7[%c0, %c0_1] : memref<16x16xf32, #tpu.memory_space<vmem>>, vector<16x16xf32>
    %c0_2 = arith.constant 0 : index
    %c0_3 = arith.constant 0 : index
    %4 = vector.load %arg3[%c0_2, %c0_3] : memref<16x32xbf16, #tpu.memory_space<vmem>>, vector<16x32xbf16>
    %c0_4 = arith.constant 0 : index
    %c0_5 = arith.constant 0 : index
    %5 = vector.load %arg4[%c0_4, %c0_5] : memref<32x16xbf16, #tpu.memory_space<vmem>>, vector<32x16xbf16>
    %cst = arith.constant dense<0.000000e+00> : vector<16x16xf32>
    %6 = tpu.matmul %4, %5, %cst {dimension_numbers = #tpu.dot_dimension_numbers<[1], [0], [0], [1], [0, 0, 1, 1], [], []>} : vector<16x32xbf16>, vector<32x16xbf16>, vector<16x16xf32> -> vector<16x16xf32>
    %7 = arith.addf %3, %6 : vector<16x16xf32>
    %c0_6 = arith.constant 0 : index
    %c0_7 = arith.constant 0 : index
    %8 = vector.load %arg7[%c0_6, %c0_7] : memref<16x16xf32, #tpu.memory_space<vmem>>, vector<16x16xf32>
    tpu.vector_store %arg7[%c0_6, %c0_7], %7 {strides = array<i32>} : memref<16x16xf32, #tpu.memory_space<vmem>>, vector<16x16xf32>,
    %c0_i32_8 = arith.constant 0 : i32
    %9 = arith.cmpi eq, %arg2, %c0_i32_8 : i32
    %10 = arith.extui %9 : i1 to i32
    %c0_i32_9 = arith.constant 0 : i32
    %11 = arith.cmpi ne, %10, %c0_i32_9 : i32
    scf.if %11 {
      %c0_10 = arith.constant 0 : index
      %c0_11 = arith.constant 0 : index
      %12 = vector.load %arg7[%c0_10, %c0_11] : memref<16x16xf32, #tpu.memory_space<vmem>>, vector<16x16xf32>
      %c0_12 = arith.constant 0 : index
      %c0_13 = arith.constant 0 : index
      %13 = vector.load %arg5[%c0_12, %c0_13] : memref<1x16xf32, #tpu.memory_space<vmem>>, vector<1x16xf32>
      %14 = vector.broadcast %13 : vector<1x16xf32> to vector<16x16xf32>
      %15 = arith.addf %12, %14 : vector<16x16xf32>
      %16 = arith.truncf %15 : vector<16x16xf32> to vector<16x16xbf16>
      %c0_14 = arith.constant 0 : index
      %c0_15 = arith.constant 0 : index
      %17 = vector.load %arg6[%c0_14, %c0_15] : memref<16x16xbf16, #tpu.memory_space<vmem>>, vector<16x16xbf16>
      tpu.vector_store %arg6[%c0_14, %c0_15], %16 {strides = array<i32>} : memref<16x16xbf16, #tpu.memory_space<vmem>>, vector<16x16xbf16>,
    } else {
    }
    return
  }
  func.func @transform_0(%arg0: i32, %arg1: i32, %arg2: i32) -> (i32, i32) {
    %c0_i32 = arith.constant 0 : i32
    return %arg0, %arg2 : i32, i32
  }
  func.func @transform_1(%arg0: i32, %arg1: i32, %arg2: i32) -> (i32, i32) {
    %c0_i32 = arith.constant 0 : i32
    return %arg2, %arg1 : i32, i32
  }
  func.func @transform_2(%arg0: i32, %arg1: i32, %arg2: i32) -> (i32, i32) {
    %c0_i32 = arith.constant 0 : i32
    %c0_i32_0 = arith.constant 0 : i32
    return %c0_i32, %arg1 : i32, i32
  }
  func.func @transform_3(%arg0: i32, %arg1: i32, %arg2: i32) -> (i32, i32) {
    %c0_i32 = arith.constant 0 : i32
    return %arg0, %arg1 : i32, i32
  }
}

module attributes {stable_mosaic.version = 11 : i64} {
  func.func @_mqa_flash_kernel(%arg0: i32, %arg1: i32, %arg2: i32, %arg3: memref<1x8x32xbf16, #tpu.memory_space<vmem>>, %arg4: memref<1x8x16xbf16, #tpu.memory_space<vmem>>, %arg5: memref<1x4x8x8xbf16, #tpu.memory_space<vmem>>, %arg6: memref<32x8xbf16, #tpu.memory_space<vmem>>, %arg7: memref<32x1xf32, #tpu.memory_space<vmem>>, %arg8: memref<32x1xf32, #tpu.memory_space<vmem>>, %arg9: memref<32x8xf32, #tpu.memory_space<vmem>>) attributes {dimension_semantics = [#tpu.dimension_semantics<parallel>, #tpu.dimension_semantics<parallel>, #tpu.dimension_semantics<arbitrary>], iteration_bounds = array<i64: 2, 1, 1>, scalar_prefetch = 0 : i64, scratch_operands = 4 : i64, tpu.core_type = #tpu.core_type<tc>, window_params = [{transform_indices = @transform_0, window_bounds = array<i64: 1, 8, 32>}, {transform_indices = @transform_1, window_bounds = array<i64: 1, 8, 16>}, {transform_indices = @transform_2, window_bounds = array<i64: 1, 4, 8, 8>}]} {
    %c0_i32 = arith.constant 0 : i32
    %0 = arith.cmpi eq, %arg2, %c0_i32 : i32
    %1 = arith.extui %0 : i1 to i32
    %c0_i32_0 = arith.constant 0 : i32
    %2 = arith.cmpi ne, %1, %c0_i32_0 : i32
    scf.if %2 {
      %c0_22 = arith.constant 0 : index
      %c0_23 = arith.constant 0 : index
      %c0_24 = arith.constant 0 : index
      %35 = vector.load %arg3[%c0_22, %c0_23, %c0_24] : memref<1x8x32xbf16, #tpu.memory_space<vmem>>, vector<1x8x32xbf16>
      %36 = vector.shape_cast %35 : vector<1x8x32xbf16> to vector<8x32xbf16>
      %cst_25 = arith.constant 3.535160e-01 : bf16
      %37 = vector.broadcast %cst_25 : bf16 to vector<8x32xbf16>
      %38 = arith.mulf %36, %37 : vector<8x32xbf16>
      %39 = vector.extract_strided_slice %38 {offsets = [0, 0], sizes = [8, 8], strides = [1, 1]} : vector<8x32xbf16> to vector<8x8xbf16>
      %c0_26 = arith.constant 0 : index
      %c0_27 = arith.constant 0 : index
      %40 = vector.load %arg6[%c0_26, %c0_27] : memref<32x8xbf16, #tpu.memory_space<vmem>>, vector<8x8xbf16>
      tpu.vector_store %arg6[%c0_26, %c0_27], %39 {strides = array<i32>} : memref<32x8xbf16, #tpu.memory_space<vmem>>, vector<8x8xbf16>,
      %41 = vector.extract_strided_slice %38 {offsets = [0, 8], sizes = [8, 8], strides = [1, 1]} : vector<8x32xbf16> to vector<8x8xbf16>
      %c8 = arith.constant 8 : index
      %c0_28 = arith.constant 0 : index
      %42 = vector.load %arg6[%c8, %c0_28] : memref<32x8xbf16, #tpu.memory_space<vmem>>, vector<8x8xbf16>
      tpu.vector_store %arg6[%c8, %c0_28], %41 {strides = array<i32>} : memref<32x8xbf16, #tpu.memory_space<vmem>>, vector<8x8xbf16>,
      %43 = vector.extract_strided_slice %38 {offsets = [0, 16], sizes = [8, 8], strides = [1, 1]} : vector<8x32xbf16> to vector<8x8xbf16>
      %c16 = arith.constant 16 : index
      %c0_29 = arith.constant 0 : index
      %44 = vector.load %arg6[%c16, %c0_29] : memref<32x8xbf16, #tpu.memory_space<vmem>>, vector<8x8xbf16>
      tpu.vector_store %arg6[%c16, %c0_29], %43 {strides = array<i32>} : memref<32x8xbf16, #tpu.memory_space<vmem>>, vector<8x8xbf16>,
      %45 = vector.extract_strided_slice %38 {offsets = [0, 24], sizes = [8, 8], strides = [1, 1]} : vector<8x32xbf16> to vector<8x8xbf16>
      %c24 = arith.constant 24 : index
      %c0_30 = arith.constant 0 : index
      %46 = vector.load %arg6[%c24, %c0_30] : memref<32x8xbf16, #tpu.memory_space<vmem>>, vector<8x8xbf16>
      tpu.vector_store %arg6[%c24, %c0_30], %45 {strides = array<i32>} : memref<32x8xbf16, #tpu.memory_space<vmem>>, vector<8x8xbf16>,
      %cst_31 = arith.constant 0xFF800000 : f32
      %47 = vector.broadcast %cst_31 : f32 to vector<32x1xf32>
      %c0_32 = arith.constant 0 : index
      %c0_33 = arith.constant 0 : index
      %48 = vector.load %arg7[%c0_32, %c0_33] : memref<32x1xf32, #tpu.memory_space<vmem>>, vector<32x1xf32>
      tpu.vector_store %arg7[%c0_32, %c0_33], %47 {strides = array<i32>} : memref<32x1xf32, #tpu.memory_space<vmem>>, vector<32x1xf32>,
      %cst_34 = arith.constant 0.000000e+00 : f32
      %49 = vector.broadcast %cst_34 : f32 to vector<32x1xf32>
      %c0_35 = arith.constant 0 : index
      %c0_36 = arith.constant 0 : index
      %50 = vector.load %arg8[%c0_35, %c0_36] : memref<32x1xf32, #tpu.memory_space<vmem>>, vector<32x1xf32>
      tpu.vector_store %arg8[%c0_35, %c0_36], %49 {strides = array<i32>} : memref<32x1xf32, #tpu.memory_space<vmem>>, vector<32x1xf32>,
      %cst_37 = arith.constant 0.000000e+00 : f32
      %51 = vector.broadcast %cst_37 : f32 to vector<32x8xf32>
      %c0_38 = arith.constant 0 : index
      %c0_39 = arith.constant 0 : index
      %52 = vector.load %arg9[%c0_38, %c0_39] : memref<32x8xf32, #tpu.memory_space<vmem>>, vector<32x8xf32>
      tpu.vector_store %arg9[%c0_38, %c0_39], %51 {strides = array<i32>} : memref<32x8xf32, #tpu.memory_space<vmem>>, vector<32x8xf32>,
    } else {
    }
    %c0 = arith.constant 0 : index
    %c0_1 = arith.constant 0 : index
    %c0_2 = arith.constant 0 : index
    %3 = vector.load %arg4[%c0, %c0_1, %c0_2] : memref<1x8x16xbf16, #tpu.memory_space<vmem>>, vector<1x8x16xbf16>
    %4 = vector.shape_cast %3 : vector<1x8x16xbf16> to vector<8x16xbf16>
    %5 = vector.extract_strided_slice %4 {offsets = [0, 0], sizes = [8, 8], strides = [1, 1]} : vector<8x16xbf16> to vector<8x8xbf16>
    %6 = vector.extract_strided_slice %4 {offsets = [0, 8], sizes = [8, 8], strides = [1, 1]} : vector<8x16xbf16> to vector<8x8xbf16>
    %c0_3 = arith.constant 0 : index
    %c0_4 = arith.constant 0 : index
    %7 = vector.load %arg6[%c0_3, %c0_4] : memref<32x8xbf16, #tpu.memory_space<vmem>>, vector<32x8xbf16>
    %cst = arith.constant dense<0.000000e+00> : vector<32x8xf32>
    %8 = tpu.matmul %7, %5, %cst {dimension_numbers = #tpu.dot_dimension_numbers<[1], [1], [0], [0], [0, 0, 1, 0], [], []>} : vector<32x8xbf16>, vector<8x8xbf16>, vector<32x8xf32> -> vector<32x8xf32>
    %c0_5 = arith.constant 0 : index
    %c0_6 = arith.constant 0 : index
    %9 = vector.load %arg7[%c0_5, %c0_6] : memref<32x1xf32, #tpu.memory_space<vmem>>, vector<32x1xf32>
    %cst_7 = arith.constant dense<0xFF800000> : vector<32xf32>
    %10 = vector.multi_reduction <maximumf>, %8, %cst_7 [1] : vector<32x8xf32> to vector<32xf32>
    %11 = vector.shape_cast %10 : vector<32xf32> to vector<32x1xf32>
    %12 = arith.maximumf %9, %11 : vector<32x1xf32>
    %13 = arith.subf %9, %12 : vector<32x1xf32>
    %14 = math.exp %13 : vector<32x1xf32>
    %15 = vector.broadcast %12 : vector<32x1xf32> to vector<32x8xf32>
    %16 = arith.subf %8, %15 : vector<32x8xf32>
    %17 = math.exp %16 : vector<32x8xf32>
    %c0_8 = arith.constant 0 : index
    %c0_9 = arith.constant 0 : index
    %18 = vector.load %arg8[%c0_8, %c0_9] : memref<32x1xf32, #tpu.memory_space<vmem>>, vector<32x1xf32>
    %19 = arith.mulf %14, %18 : vector<32x1xf32>
    %cst_10 = arith.constant dense<0.000000e+00> : vector<32xf32>
    %20 = vector.multi_reduction <add>, %17, %cst_10 [1] : vector<32x8xf32> to vector<32xf32>
    %21 = vector.shape_cast %20 : vector<32xf32> to vector<32x1xf32>
    %22 = arith.addf %19, %21 : vector<32x1xf32>
    %c0_11 = arith.constant 0 : index
    %c0_12 = arith.constant 0 : index
    %23 = vector.load %arg8[%c0_11, %c0_12] : memref<32x1xf32, #tpu.memory_space<vmem>>, vector<32x1xf32>
    tpu.vector_store %arg8[%c0_11, %c0_12], %22 {strides = array<i32>} : memref<32x1xf32, #tpu.memory_space<vmem>>, vector<32x1xf32>,
    %c0_13 = arith.constant 0 : index
    %c0_14 = arith.constant 0 : index
    %24 = vector.load %arg9[%c0_13, %c0_14] : memref<32x8xf32, #tpu.memory_space<vmem>>, vector<32x8xf32>
    %25 = vector.broadcast %14 : vector<32x1xf32> to vector<32x8xf32>
    %26 = arith.mulf %25, %24 : vector<32x8xf32>
    %27 = arith.truncf %17 : vector<32x8xf32> to vector<32x8xbf16>
    %cst_15 = arith.constant dense<0.000000e+00> : vector<32x8xf32>
    %28 = tpu.matmul %27, %6, %cst_15 {dimension_numbers = #tpu.dot_dimension_numbers<[1], [0], [0], [1], [0, 0, 1, 1], [], []>} : vector<32x8xbf16>, vector<8x8xbf16>, vector<32x8xf32> -> vector<32x8xf32>
    %29 = arith.addf %26, %28 : vector<32x8xf32>
    %c0_16 = arith.constant 0 : index
    %c0_17 = arith.constant 0 : index
    %30 = vector.load %arg9[%c0_16, %c0_17] : memref<32x8xf32, #tpu.memory_space<vmem>>, vector<32x8xf32>
    tpu.vector_store %arg9[%c0_16, %c0_17], %29 {strides = array<i32>} : memref<32x8xf32, #tpu.memory_space<vmem>>, vector<32x8xf32>,
    %c0_18 = arith.constant 0 : index
    %c0_19 = arith.constant 0 : index
    %31 = vector.load %arg7[%c0_18, %c0_19] : memref<32x1xf32, #tpu.memory_space<vmem>>, vector<32x1xf32>
    tpu.vector_store %arg7[%c0_18, %c0_19], %12 {strides = array<i32>} : memref<32x1xf32, #tpu.memory_space<vmem>>, vector<32x1xf32>,
    %c0_i32_20 = arith.constant 0 : i32
    %32 = arith.cmpi eq, %arg2, %c0_i32_20 : i32
    %33 = arith.extui %32 : i1 to i32
    %c0_i32_21 = arith.constant 0 : i32
    %34 = arith.cmpi ne, %33, %c0_i32_21 : i32
    scf.if %34 {
      %c0_22 = arith.constant 0 : index
      %c0_23 = arith.constant 0 : index
      %35 = vector.load %arg9[%c0_22, %c0_23] : memref<32x8xf32, #tpu.memory_space<vmem>>, vector<32x8xf32>
      %c0_24 = arith.constant 0 : index
      %c0_25 = arith.constant 0 : index
      %36 = vector.load %arg8[%c0_24, %c0_25] : memref<32x1xf32, #tpu.memory_space<vmem>>, vector<32x1xf32>
      %37 = tpu.reciprocal %36 {approx = true} : vector<32x1xf32> -> vector<32x1xf32>
      %38 = vector.broadcast %37 : vector<32x1xf32> to vector<32x8xf32>
      %39 = arith.mulf %35, %38 : vector<32x8xf32>
      %40 = vector.shape_cast %39 : vector<32x8xf32> to vector<4x8x8xf32>
      %41 = tpu.transpose %40, [0, 2, 1] : vector<4x8x8xf32> -> vector<4x8x8xf32>
      %42 = arith.truncf %41 : vector<4x8x8xf32> to vector<4x8x8xbf16>
      %c0_26 = arith.constant 0 : index
      %c0_27 = arith.constant 0 : index
      %c0_28 = arith.constant 0 : index
      %c0_29 = arith.constant 0 : index
      %43 = vector.load %arg5[%c0_26, %c0_27, %c0_28, %c0_29] : memref<1x4x8x8xbf16, #tpu.memory_space<vmem>>, vector<1x4x8x8xbf16>
      %44 = vector.shape_cast %43 : vector<1x4x8x8xbf16> to vector<4x8x8xbf16>
      %45 = vector.shape_cast %42 : vector<4x8x8xbf16> to vector<1x4x8x8xbf16>
      tpu.vector_store %arg5[%c0_26, %c0_27, %c0_28, %c0_29], %45 {strides = array<i32>} : memref<1x4x8x8xbf16, #tpu.memory_space<vmem>>, vector<1x4x8x8xbf16>,
    } else {
    }
    return
  }
  func.func @transform_0(%arg0: i32, %arg1: i32, %arg2: i32) -> (i32, i32, i32) {
    %c0_i32 = arith.constant 0 : i32
    %c0_i32_0 = arith.constant 0 : i32
    return %arg0, %arg1, %c0_i32 : i32, i32, i32
  }
  func.func @transform_1(%arg0: i32, %arg1: i32, %arg2: i32) -> (i32, i32, i32) {
    %c0_i32 = arith.constant 0 : i32
    %c0_i32_0 = arith.constant 0 : i32
    return %arg0, %arg2, %c0_i32 : i32, i32, i32
  }
  func.func @transform_2(%arg0: i32, %arg1: i32, %arg2: i32) -> (i32, i32, i32, i32) {
    %c0_i32 = arith.constant 0 : i32
    %c0_i32_0 = arith.constant 0 : i32
    %c0_i32_1 = arith.constant 0 : i32
    return %arg0, %c0_i32, %c0_i32_0, %arg1 : i32, i32, i32, i32
  }
}

module attributes {stable_mosaic.version = 11 : i64} {
  func.func @_linear_kernel(%arg0: i32, %arg1: i32, %arg2: i32, %arg3: memref<16x32xbf16, #tpu.memory_space<vmem>>, %arg4: memref<32x32xbf16, #tpu.memory_space<vmem>>, %arg5: memref<1x32xf32, #tpu.memory_space<vmem>>, %arg6: memref<16x32xf32, #tpu.memory_space<vmem>>, %arg7: memref<16x32xf32, #tpu.memory_space<vmem>>) attributes {dimension_semantics = [#tpu.dimension_semantics<parallel>, #tpu.dimension_semantics<parallel>, #tpu.dimension_semantics<arbitrary>], iteration_bounds = array<i64: 1, 1, 1>, scalar_prefetch = 0 : i64, scratch_operands = 1 : i64, tpu.core_type = #tpu.core_type<tc>, window_params = [{transform_indices = @transform_0, window_bounds = array<i64: 16, 32>}, {transform_indices = @transform_1, window_bounds = array<i64: 32, 32>}, {transform_indices = @transform_2, window_bounds = array<i64: 1, 32>}, {transform_indices = @transform_3, window_bounds = array<i64: 16, 32>}]} {
    %c0_i32 = arith.constant 0 : i32
    %0 = arith.cmpi eq, %arg2, %c0_i32 : i32
    %1 = arith.extui %0 : i1 to i32
    %c0_i32_0 = arith.constant 0 : i32
    %2 = arith.cmpi ne, %1, %c0_i32_0 : i32
    scf.if %2 {
      %cst_10 = arith.constant 0.000000e+00 : f32
      %12 = vector.broadcast %cst_10 : f32 to vector<16x32xf32>
      %c0_11 = arith.constant 0 : index
      %c0_12 = arith.constant 0 : index
      %13 = vector.load %arg7[%c0_11, %c0_12] : memref<16x32xf32, #tpu.memory_space<vmem>>, vector<16x32xf32>
      tpu.vector_store %arg7[%c0_11, %c0_12], %12 {strides = array<i32>} : memref<16x32xf32, #tpu.memory_space<vmem>>, vector<16x32xf32>,
    } else {
    }
    %c0 = arith.constant 0 : index
    %c0_1 = arith.constant 0 : index
    %3 = vector.load %arg7[%c0, %c0_1] : memref<16x32xf32, #tpu.memory_space<vmem>>, vector<16x32xf32>
    %c0_2 = arith.constant 0 : index
    %c0_3 = arith.constant 0 : index
    %4 = vector.load %arg3[%c0_2, %c0_3] : memref<16x32xbf16, #tpu.memory_space<vmem>>, vector<16x32xbf16>
    %c0_4 = arith.constant 0 : index
    %c0_5 = arith.constant 0 : index
    %5 = vector.load %arg4[%c0_4, %c0_5] : memref<32x32xbf16, #tpu.memory_space<vmem>>, vector<32x32xbf16>
    %cst = arith.constant dense<0.000000e+00> : vector<16x32xf32>
    %6 = tpu.matmul %4, %5, %cst {dimension_numbers = #tpu.dot_dimension_numbers<[1], [0], [0], [1], [0, 0, 1, 1], [], []>} : vector<16x32xbf16>, vector<32x32xbf16>, vector<16x32xf32> -> vector<16x32xf32>
    %7 = arith.addf %3, %6 : vector<16x32xf32>
    %c0_6 = arith.constant 0 : index
    %c0_7 = arith.constant 0 : index
    %8 = vector.load %arg7[%c0_6, %c0_7] : memref<16x32xf32, #tpu.memory_space<vmem>>, vector<16x32xf32>
    tpu.vector_store %arg7[%c0_6, %c0_7], %7 {strides = array<i32>} : memref<16x32xf32, #tpu.memory_space<vmem>>, vector<16x32xf32>,
    %c0_i32_8 = arith.constant 0 : i32
    %9 = arith.cmpi eq, %arg2, %c0_i32_8 : i32
    %10 = arith.extui %9 : i1 to i32
    %c0_i32_9 = arith.constant 0 : i32
    %11 = arith.cmpi ne, %10, %c0_i32_9 : i32
    scf.if %11 {
      %c0_10 = arith.constant 0 : index
      %c0_11 = arith.constant 0 : index
      %12 = vector.load %arg7[%c0_10, %c0_11] : memref<16x32xf32, #tpu.memory_space<vmem>>, vector<16x32xf32>
      %c0_12 = arith.constant 0 : index
      %c0_13 = arith.constant 0 : index
      %13 = vector.load %arg5[%c0_12, %c0_13] : memref<1x32xf32, #tpu.memory_space<vmem>>, vector<1x32xf32>
      %14 = vector.broadcast %13 : vector<1x32xf32> to vector<16x32xf32>
      %15 = arith.addf %12, %14 : vector<16x32xf32>
      %c0_14 = arith.constant 0 : index
      %c0_15 = arith.constant 0 : index
      %16 = vector.load %arg6[%c0_14, %c0_15] : memref<16x32xf32, #tpu.memory_space<vmem>>, vector<16x32xf32>
      tpu.vector_store %arg6[%c0_14, %c0_15], %15 {strides = array<i32>} : memref<16x32xf32, #tpu.memory_space<vmem>>, vector<16x32xf32>,
    } else {
    }
    return
  }
  func.func @transform_0(%arg0: i32, %arg1: i32, %arg2: i32) -> (i32, i32) {
    %c0_i32 = arith.constant 0 : i32
    return %arg0, %arg2 : i32, i32
  }
  func.func @transform_1(%arg0: i32, %arg1: i32, %arg2: i32) -> (i32, i32) {
    %c0_i32 = arith.constant 0 : i32
    return %arg2, %arg1 : i32, i32
  }
  func.func @transform_2(%arg0: i32, %arg1: i32, %arg2: i32) -> (i32, i32) {
    %c0_i32 = arith.constant 0 : i32
    %c0_i32_0 = arith.constant 0 : i32
    return %c0_i32, %arg1 : i32, i32
  }
  func.func @transform_3(%arg0: i32, %arg1: i32, %arg2: i32) -> (i32, i32) {
    %c0_i32 = arith.constant 0 : i32
    return %arg0, %arg1 : i32, i32
  }
}

</mosaic_0001>

<bundles_post_ra>
// kernel: multi_query_attention_forward.5
= control target key start
LH: loop header
LB: loop body
LE: loop exit
PB: predicated region body
PF: predicated region fallthrough
CT: control target
= control target key end

     0   :  { %vm19_vm0 = vcmask 130048   ;;  %v151_v0 = vmov 0.0   ;;  %vm152_vm1 = vmmov 0   ;;  %vm47_vm2 = vcmask 261120   ;;  %s195_s1 = inlined_call_operand.vmem [shape: bf16[32,16], index: 1, kind: input, shape index: {}]   ;;  %s196_s0 = inlined_call_operand.vmem [shape: bf16[16,32], index: 0, kind: input, shape index: {}]   ;;  %s197_s2 = inlined_call_operand.vmem [shape: f32[1,16], index: 2, kind: input, shape index: {}]   ;;  %s198_s3 = inlined_call_operand.vmem [shape: bf16[16,16], index: 3, kind: output, shape index: {}]  }
   0x1   :  { %138 = vmatprep.subr.bf16.mxu0 %v151_v0  ;;  %v148_v1 = vld [vmem:[%s195_s1 + $0x8] sm:$0xff]   ;;  %142 = vmatprep.mubr.msk.bf16.mxu0 %vm152_vm1, %v151_v0  ;;  %20 = vst.msk [vmem:[#allocation2] sm:$0xff] %vm19_vm0, %v151_v0  ;;  %21 = vst.msk [vmem:[#allocation2 + $0x8] sm:$0xff] %vm19_vm0, %v151_v0  ;;  %v149_v2 = vld [vmem:[%s195_s1] sm:$0xff]   ;;  %vm119_vm3 = vcmask 125952  }
   0x2   :  { %139 = vmatpush3.bf16.msra.mxu0 %v148_v1  ;;  %v150_v3 = vld [vmem:[%s196_s0] sm:$0xff]  }
   0x3   :  { %140 = vmatprep.subr.bf16.mxu0 %v151_v0  ;;  %v130_v12 = vld [vmem:[%s197_s2] ss:$0 sm:$0xff] }
   0x6   :  { %141 = vmatpush3.bf16.msra.mxu0 %v149_v2 }
   0x8   :  { %v22_v4 = vld [vmem:[#allocation2] sm:$0xff]  ;;  %v23_v8 = vld [vmem:[#allocation2 + $0x8] sm:$0xff] }
   0x9   :  { %143 = vmatmul.mubr.msk.bf16.vlgmr.msra.gmra.mxu0 %vm47_vm2, %v150_v3 }
  0xc9   :  { %v85_v5 = vpop.f32.mrf.mxu0 }
  0xca   :  { %v92_v6 = vadd.f32 %v85_v5, %v22_v4 }
  0xcb   :  { %v144_v7 = vpop.f32.mrf.mxu0 }
  0xcc   :  { %95 = vst.msk [vmem:[#allocation2] sm:$0xff] %vm19_vm0, %v92_v6 }
  0xcd   :  { %v88_v9 = vpop.f32.mrf.mxu0 }
  0xce   :  { %v93_v10 = vadd.f32 %v88_v9, %v23_v8 }
  0xcf   :  { %v145_v11 = vpop.f32.mrf.mxu0 }
  0xd0   :  { %96 = vst.msk [vmem:[#allocation2 + $0x8] sm:$0xff] %vm19_vm0, %v93_v10 }
  0xd3   :  { %v100_v13 = vld [vmem:[#allocation2] sm:$0xff] }
  0xd4   :  { %v109_v14 = vadd.f32 %v130_v12, %v100_v13 }
  0xd6   :  { %v133_v15 = vpack.c.bf16 %v109_v14, %v109_v14 }
  0xd7   :  { %v101_v16 = vld [vmem:[#allocation2 + $0x8] sm:$0xff] }
  0xd8   :  { %120 = vst.msk [vmem:[%s198_s3] sm:$0xf] %vm119_vm3, %v133_v15  ;;  %v110_v17 = vadd.f32 %v130_v12, %v101_v16 }
  0xda   :  { %v134_v18 = vpack.c.bf16 %v110_v17, %v110_v17 }
  0xdc   :  { %121 = vst.msk [vmem:[%s198_s3 + $0x4] sm:$0xf] %vm119_vm3, %v134_v18 }

// kernel: multi_query_attention_forward.4
= control target key start
LH: loop header
LB: loop body
LE: loop exit
PB: predicated region body
PF: predicated region fallthrough
CT: control target
= control target key end

     0   :  { %vm19_vm0 = vcmask 261120   ;;  %v150_v0 = vmov 0.0   ;;  %vm151_vm1 = vmmov 0   ;;  %vm118_vm2 = vcmask 257024   ;;  %s195_s1 = inlined_call_operand.vmem [shape: bf16[32,32], index: 1, kind: input, shape index: {}]   ;;  %s196_s0 = inlined_call_operand.vmem [shape: bf16[16,32], index: 0, kind: input, shape index: {}]   ;;  %s197_s2 = inlined_call_operand.vmem [shape: f32[1,32], index: 2, kind: input, shape index: {}]   ;;  %s198_s3 = inlined_call_operand.vmem [shape: bf16[16,32], index: 3, kind: output, shape index: {}]  }
   0x1   :  { %137 = vmatprep.subr.bf16.mxu0 %v150_v0  ;;  %v147_v1 = vld [vmem:[%s195_s1 + $0x8] sm:$0xff]   ;;  %141 = vmatprep.mubr.msk.bf16.mxu0 %vm151_vm1, %v150_v0  ;;  %20 = vst.msk [vmem:[#allocation2] sm:$0xff] %vm19_vm0, %v150_v0  ;;  %21 = vst.msk [vmem:[#allocation2 + $0x8] sm:$0xff] %vm19_vm0, %v150_v0  ;;  %v148_v2 = vld [vmem:[%s195_s1] sm:$0xff]  }
   0x2   :  { %138 = vmatpush3.bf16.msra.mxu0 %v147_v1  ;;  %v149_v3 = vld [vmem:[%s196_s0] sm:$0xff]  }
   0x3   :  { %139 = vmatprep.subr.bf16.mxu0 %v150_v0  ;;  %v129_v12 = vld [vmem:[%s197_s2] ss:$0 sm:$0xff] }
   0x6   :  { %140 = vmatpush3.bf16.msra.mxu0 %v148_v2 }
   0x8   :  { %v22_v4 = vld [vmem:[#allocation2] sm:$0xff]  ;;  %v23_v8 = vld [vmem:[#allocation2 + $0x8] sm:$0xff] }
   0x9   :  { %142 = vmatmul.mubr.msk.bf16.vlgmr.msra.gmra.mxu0 %vm19_vm0, %v149_v3 }
  0xc9   :  { %v85_v5 = vpop.f32.mrf.mxu0 }
  0xca   :  { %v92_v6 = vadd.f32 %v85_v5, %v22_v4 }
  0xcb   :  { %v143_v7 = vpop.f32.mrf.mxu0 }
  0xcc   :  { %94 = vst.msk [vmem:[#allocation2] sm:$0xff] %vm19_vm0, %v92_v6 }
  0xcd   :  { %v88_v9 = vpop.f32.mrf.mxu0 }
  0xce   :  { %v93_v10 = vadd.f32 %v88_v9, %v23_v8 }
  0xcf   :  { %v144_v11 = vpop.f32.mrf.mxu0 }
  0xd0   :  { %95 = vst.msk [vmem:[#allocation2 + $0x8] sm:$0xff] %vm19_vm0, %v93_v10 }
  0xd3   :  { %v99_v13 = vld [vmem:[#allocation2] sm:$0xff] }
  0xd4   :  { %v108_v14 = vadd.f32 %v129_v12, %v99_v13 }
  0xd6   :  { %v132_v15 = vpack.c.bf16 %v108_v14, %v108_v14 }
  0xd7   :  { %v100_v16 = vld [vmem:[#allocation2 + $0x8] sm:$0xff] }
  0xd8   :  { %119 = vst.msk [vmem:[%s198_s3] sm:$0xf] %vm118_vm2, %v132_v15  ;;  %v109_v17 = vadd.f32 %v129_v12, %v100_v16 }
  0xda   :  { %v133_v18 = vpack.c.bf16 %v109_v17, %v109_v17 }
  0xdc   :  { %120 = vst.msk [vmem:[%s198_s3 + $0x4] sm:$0xf] %vm118_vm2, %v133_v18 }

// kernel: multi_query_attention_forward.7
= control target key start
LH: loop header
LB: loop body
LE: loop exit
PB: predicated region body
PF: predicated region fallthrough
CT: control target
= control target key end

     0   :  { %v175_v1 = vmov 0.0   ;;  %vm176_vm0 = vmmov 0   ;;  %vm20_vm1 = vcmask 261120   ;;  %s222_s0 = inlined_call_operand.vmem [shape: bf16[16,32], index: 0, kind: input, shape index: {}]   ;;  %s223_s1 = inlined_call_operand.vmem [shape: bf16[32,32], index: 1, kind: input, shape index: {}]   ;;  %s224_s2 = inlined_call_operand.vmem [shape: f32[1,32], index: 2, kind: input, shape index: {}]   ;;  %s225_s3 = inlined_call_operand.hbm [shape: f32[16,32], index: 3, kind: output, shape index: {}]  }
   0x1   :  { %v150_v0 = vld [vmem:[%s223_s1 + $0x8] sm:$0xff]   ;;  %137 = vmatprep.subr.bf16.mxu0 %v175_v1  ;;  %v151_v2 = vld [vmem:[%s223_s1] sm:$0xff]   ;;  %141 = vmatprep.mubr.msk.bf16.mxu0 %vm176_vm0, %v175_v1  ;;  %21 = vst.msk [vmem:[#allocation2] sm:$0xff] %vm20_vm1, %v175_v1  ;;  %22 = vst.msk [vmem:[#allocation2 + $0x8] sm:$0xff] %vm20_vm1, %v175_v1 }
   0x2   :  { %138 = vmatpush3.bf16.msra.mxu0 %v150_v0 }
   0x3   :  { %139 = vmatprep.subr.bf16.mxu0 %v175_v1 }
   0x4   :  { %8 = vsyncpa [#allocation4], 0  ;;  %v152_v3 = vld [vmem:[%s222_s0] sm:$0xff]   ;;  %s177_s0 = smov [#allocation3]  }
   0x5   :  { %v133_v12 = vld [vmem:[%s224_s2] ss:$0 sm:$0xff]  ;;  %s118_s19 = sshll.u32 %s177_s0, 4  ;;  %s119_s19 = int_to_ptr.vmem [resolvable:$true] %s118_s19 }
   0x6   :  { %140 = vmatpush3.bf16.msra.mxu0 %v151_v2  ;;  %s153_s20 = scalar_lea.vmem %s119_s19, 256  ;;  %p158_p1 = scmp.lt.s32.totalorder %s119_s19, %s119_s19 }
   0x7   :  { %p154_p0 = scmp.ne.s32.totalorder %s119_s19, %s153_s20  ;;  %p159_p2 = scmp.lt.s32.totalorder %s153_s20, %s153_s20 }
   0x8   :  { %v23_v4 = vld [vmem:[#allocation2] sm:$0xff]  ;;  %v24_v8 = vld [vmem:[#allocation2 + $0x8] sm:$0xff] }
   0x9   :  { %142 = vmatmul.mubr.msk.bf16.vlgmr.msra.gmra.mxu0 %vm20_vm1, %v152_v3  ;;  %p160_p3 = por %p159_p2, %p158_p1 }
   0xb   :  { %p161_p4 = pnand %p160_p3, %p154_p0 }
  0xc9   :  { %v86_v5 = vpop.f32.mrf.mxu0 }
  0xca   :  { %v93_v6 = vadd.f32 %v86_v5, %v23_v4 }
  0xcb   :  { %v143_v7 = vpop.f32.mrf.mxu0 }
  0xcc   :  { %95 = vst.msk [vmem:[#allocation2] sm:$0xff] %vm20_vm1, %v93_v6 }
  0xcd   :  { %v89_v9 = vpop.f32.mrf.mxu0 }
  0xce   :  { %v94_v10 = vadd.f32 %v89_v9, %v24_v8 }
  0xcf   :  { %v144_v11 = vpop.f32.mrf.mxu0 }
  0xd0   :  { %96 = vst.msk [vmem:[#allocation2 + $0x8] sm:$0xff] %vm20_vm1, %v94_v10 }
  0xd3   :  { %v100_v13 = vld [vmem:[#allocation2] sm:$0xff] }
  0xd4   :  { %v109_v14 = vadd.f32 %v133_v12, %v100_v13 }
  0xd6   :  { %111 = vst.msk [vmem:[#allocation3] sm:$0xff] %vm20_vm1, %v109_v14 }
  0xd7   :  { %v101_v15 = vld [vmem:[#allocation2 + $0x8] sm:$0xff] }
  0xd8   :  { %v110_v16 = vadd.f32 %v133_v12, %v101_v15 }
  0xda   :  { %112 = vst.msk [vmem:[#allocation3 + $0x8] sm:$0xff] %vm20_vm1, %v110_v16 }
  0xdb   :  { %164 = shalt.err (!%p161_p4)
}
  0xdc   :  { %s178_s21 = smov 128   ;;  %s179_s2 = smov 8  }
  0xdd   :  { %124 = dma.vmem_to_hbm [thread:$0]  %s119_s19, 256, %s225_s3, [#allocation4], %s178_s21, %s178_s21, %s179_s2  }
  0xde   :  { %173 = dma.done.wait [#allocation4], 256  }
  0xdf   :  { %174 = vsyncadd [#allocation4], 4294967040 }
  0xe0   :  { %128 = vsyncpa [#allocation4], 1 }

// kernel: multi_query_attention_forward.6
= control target key start
LH: loop header
LB: loop body
LE: loop exit
PB: predicated region body
PF: predicated region fallthrough
CT: control target
= control target key end

     0   :  { %s947_s9 = smov 0   ;;  %s949_s10 = smov 0   ;;  %s1045_s0 = inlined_call_operand.vmem [shape: bf16[2,8,32], index: 0, kind: input, shape index: {}]   ;;  %s1046_s1 = inlined_call_operand.vmem [shape: bf16[2,8,16], index: 1, kind: input, shape index: {}]   ;;  %s1047_s2 = inlined_call_operand.vmem [shape: bf16[2,4,8,8], index: 2, kind: output, shape index: {}]  }
   0x1   :  { %s951_s11 = smov 0  }
   0x2 LB: > { %s31_s12 = sadd.s32 1, %s920_s10  ;;  %p795_p0 = scmp.ge.s32.totalorder %s924_s11, 1  ;;  %s924_s11 = sphi %s951_s11, %s12_s11   ;;  %s920_s10 = sphi %s949_s10, %s1049_s10   ;;  %s916_s9 = sphi %s947_s9, %s1048_s9  }
   0x3   : > { %p33_p1 = scmp.ge.s32.totalorder %s31_s12, 2  ;;  %p151_p2 = scmp.lt.s32.totalorder %s924_s11, 3 }
   0x5   : > { %s1051_s12 = smov (%p33_p1, %s31_s12), 0  ;;  %p152_p3 = pnand %p795_p0, %p151_p2 }
   0x6   : > { %p185_p4 = scmp.lt.s32.totalorder (!%p152_p3), %s916_s9, 1  ;;  %s926_s20 = smov (!%p152_p3), 120  }
   0x7   : > { %155 = sbr.rel (%p152_p3) target bundleno = 1060 (0x424), region = 28  ;;  %s927_s21 = smov (!%p152_p3), 104  }
   0x8   : > { %s928_s22 = smov (!%p152_p3), 112  }
   0xc   : > { %s1053_s9 = smov (!%p185_p4, %s916_s9), 1  ;;  %vm239_vm0 = vcmask 64512   ;;  %vm215_vm1 = vcmask 60416   ;;  %vm230_vm2 = vcmask 7168   ;;  %v929_v9 = vmov -inf  }
   0xd   : > { %s796_s13 = sshll.u32 %s1053_s9, 2  ;;  %231 = vst.msk [vmem:[#allocation3] sm:$0xff] %vm230_vm2, %v929_v9  ;;  %232 = vst.msk [vmem:[#allocation3 + $0x8] sm:$0xff] %vm230_vm2, %v929_v9  ;;  %v930_v18 = vmov 0   ;;  %v931_v19 = vmov 0.0   ;;  %vm452_vm3 = vcmask 1043456  }
   0xe   : > { %s191_s16 = scalar_lea.vmem %s1045_s0, %s796_s13  ;;  %s198_s19 = scalar_lea.vmem %s1046_s1, %s796_s13  ;;  %233 = vst.msk [vmem:[#allocation3 + $0x10] sm:$0xff] %vm230_vm2, %v929_v9  ;;  %234 = vst.msk [vmem:[#allocation3 + $0x18] sm:$0xff] %vm230_vm2, %v929_v9  ;;  %860 = vset.pattern.permute.xlu0 %v930_v18  ;;  %861 = vset.pattern.permute.xlu1 %v930_v18 }
   0xf   : > { %v213_v0 = vld [vmem:[%s191_s16] sm:$0xf]  ;;  %235 = vst.msk [vmem:[#allocation4] sm:$0xff] %vm230_vm2, %v931_v19  ;;  %236 = vst.msk [vmem:[#allocation4 + $0x8] sm:$0xff] %vm230_vm2, %v931_v19  ;;  %s809_s23 = sshll.u32 %s1053_s9, 4 }
  0x10   : > { %v974_v1 = vld [vmem:[%s198_s19] sm:$0xf]  ;;  %v214_v2 = vmul.bf16 1052065461, %v213_v0  ;;  %237 = vst.msk [vmem:[#allocation4 + $0x10] sm:$0xff] %vm230_vm2, %v931_v19  ;;  %238 = vst.msk [vmem:[#allocation4 + $0x18] sm:$0xff] %vm230_vm2, %v931_v19  ;;  %s206_s26 = scalar_lea.vmem %s1047_s2, %s809_s23 }
  0x11   : > { %828 = vmatprep.subr.msk.bf16.mxu0 %vm239_vm0, %v974_v1  ;;  %v267_v3 = vsel %vm239_vm0, %v974_v1, 0  ;;  %240 = vst.msk [vmem:[#allocation5] sm:$0xff] %vm239_vm0, %v931_v19  ;;  %241 = vst.msk [vmem:[#allocation5 + $0x8] sm:$0xff] %vm239_vm0, %v931_v19  ;;  %v804_v36 = vcombine.low %v974_v1, %v974_v1 }
  0x12   : > { %817 = vmatpush3.bf16.xpose.msra.mxu0 %v267_v3  ;;  %218 = vrot.lane.b32.xlu0 %v214_v2, %s926_s20  ;;  %216 = vst.msk [vmem:[#allocation2] sm:$0xf] %vm215_vm1, %v214_v2 }
  0x13   : > { %226 = vrot.lane.b32.xlu1 %v214_v2, %s927_s21  ;;  %242 = vst.msk [vmem:[#allocation5 + $0x10] sm:$0xff] %vm239_vm0, %v931_v19  ;;  %243 = vst.msk [vmem:[#allocation5 + $0x18] sm:$0xff] %vm239_vm0, %v931_v19 }
  0x14   : > { %v318_v20 = vld [vmem:[#allocation3] sm:$0xff]  ;;  %v319_v24 = vld [vmem:[#allocation3 + $0x8] sm:$0xff] }
  0x15   : > { %v1003_v23 = vld [vmem:[#allocation3 + $0x18] sm:$0xff]  ;;  %v320_v30 = vld [vmem:[#allocation3 + $0x10] sm:$0xff] }
  0x16   : > { %222 = vrot.lane.b32.xlu0 %v214_v2, %s928_s22 }
  0x17   : > { %v384_v9 = vld [vmem:[#allocation4 + $0x10] sm:$0xff] }
  0x84   : > { %v219_v4 = vpop.permute.xlu0 %218 }
  0x85   : > { %v227_v5 = vpop.permute.xlu1 %226  ;;  %221 = vst.msk [vmem:[#allocation2 + $0x4] sm:$0xf] %vm215_vm1, %v219_v4 }
  0x86   : > { %229 = vst.msk [vmem:[#allocation2 + $0xc] sm:$0xf] %vm215_vm1, %v227_v5  ;;  %v382_v5 = vld [vmem:[#allocation4] sm:$0xff] }
  0x88   : > { %v223_v6 = vpop.permute.xlu0 %222 }
  0x89   : > { %225 = vst.msk [vmem:[#allocation2 + $0x8] sm:$0xf] %vm215_vm1, %v223_v6 }
  0x8c   : > { %v876_v7 = vld [vmem:[#allocation2] sm:$0xff]  }
  0x8d   : > { %818 = vmatprep.mubr.msk.bf16.mxu0 %vm239_vm0, %v876_v7 }
  0x90   : > { %v877_v8 = vld [vmem:[#allocation2 + $0x8] sm:$0xff]  }
  0x91   : > { %819 = vmatmul.mubr.msk.bf16.vlgmr.msra.gmra.mxu0 %vm239_vm0, %v877_v8 }
 0x151   : > { %v820_v10 = vpop.f32.mrf.mxu0 }
 0x152   : > { %v328_v17 = vsel %vm239_vm0, %v820_v10, -inf }
 0x153   : > { %v303_v11 = vpop.f32.mrf.mxu0 }
 0x154   : > { %v322_v12 = vsel %vm239_vm0, %v303_v11, -inf }
 0x155   : > { %323 = vmax.xlane.f32.xlu1 %v322_v12  ;;  %v821_v13 = vpop.f32.mrf.mxu0  ;;  %v383_v12 = vld [vmem:[#allocation4 + $0x8] sm:$0xff] }
 0x156   : > { %v331_v15 = vsel %vm239_vm0, %v821_v13, -inf }
 0x157   : > { %v306_v14 = vpop.f32.mrf.mxu0 }
 0x158   : > { %v325_v16 = vsel %vm239_vm0, %v306_v14, -inf }
 0x159   : > { %332 = vmax.xlane.f32.xlu1 %v331_v15  ;;  %326 = vmax.xlane.f32.xlu0 %v325_v16 }
 0x15d   : > { %329 = vmax.xlane.f32.xlu0 %v328_v17  ;;  %v385_v17 = vld [vmem:[#allocation4 + $0x18] sm:$0xff] }
 0x1de   : > { %v324_v21 = vpop.xlane.xlu1 %323 }
 0x1df   : > { %v334_v22 = vmax.f32 %v318_v20, %v324_v21 }
 0x1e1   : > { %v338_v25 = vsub.f32 %v318_v20, %v334_v22  ;;  %513 = vst.msk [vmem:[#allocation3] sm:$0xff] %vm230_vm2, %v334_v22  ;;  %352 = vperm.xlu0 %860, %v334_v22  }
 0x1e2   : > { %v333_v26 = vpop.xlane.xlu1 %332  ;;  %v327_v27 = vpop.xlane.xlu0 %326 }
 0x1e3   : > { %v337_v28 = vmax.f32 %v1003_v23, %v333_v26  ;;  %v335_v29 = vmax.f32 %v319_v24, %v327_v27  ;;  %v342_v59 = vmul.f32 1.442695, %v338_v25 }
 0x1e5   : > { %v341_v31 = vsub.f32 %v1003_v23, %v337_v28  ;;  %516 = vst.msk [vmem:[#allocation3 + $0x18] sm:$0xff] %vm230_vm2, %v337_v28  ;;  %v339_v32 = vsub.f32 %v319_v24, %v335_v29  ;;  %514 = vst.msk [vmem:[#allocation3 + $0x8] sm:$0xff] %vm230_vm2, %v335_v29 }
 0x1e6   : > { %v330_v33 = vpop.xlane.xlu0 %329 }
 0x1e7   : > { %v336_v34 = vmax.f32 %v320_v30, %v330_v33  ;;  %v344_v62 = vmul.f32 1.442695, %v339_v32  ;;  %v348_v0 = vmul.f32 1.442695, %v341_v31  ;;  %v413_v31 = vld [vmem:[#allocation5 + $0x10] sm:$0xff]  ;;  %v411_v32 = vld [vmem:[#allocation5] sm:$0xff] }
 0x1e9   : > { %v340_v35 = vsub.f32 %v320_v30, %v336_v34  ;;  %515 = vst.msk [vmem:[#allocation3 + $0x10] sm:$0xff] %vm230_vm2, %v336_v34  ;;  %362 = vperm.xlu1 %861, %v336_v34   ;;  %v414_v34 = vld [vmem:[#allocation5 + $0x18] sm:$0xff] }
 0x1eb   : > { %v346_v63 = vmul.f32 1.442695, %v340_v35 }
 0x1ed   : > { %357 = vperm.xlu1 %861, %v335_v29  }
 0x1f1   : > { %367 = vperm.xlu1 %861, %v337_v28  }
 0x1f5   : > { %444 = vrot.lane.b32.xlu1 %v804_v36, %s926_s20 }
 0x25c   : > { %v353_v37 = vpop.permute.xlu0 %352 }
 0x25d   : > { %v370_v38 = vsub.f32 %v303_v11, %v353_v37 }
 0x25f   : > { %v374_v39 = vmul.f32 1.442695, %v370_v38 }
 0x261   : > { %878 = vpow2.f32 %v374_v39  ;;  %v412_v39 = vld [vmem:[#allocation5 + $0x8] sm:$0xff] }
 0x264   : > { %v363_v40 = vpop.permute.xlu1 %362 }
 0x265   : > { %v372_v41 = vsub.f32 %v820_v10, %v363_v40 }
 0x267   : > { %v378_v42 = vmul.f32 1.442695, %v372_v41 }
 0x268   : > { %v358_v43 = vpop.permute.xlu1 %357 }
 0x269   : > { %880 = vpow2.f32 %v378_v42  ;;  %v371_v44 = vsub.f32 %v306_v14, %v358_v43 }
 0x26b   : > { %v376_v45 = vmul.f32 1.442695, %v371_v44 }
 0x26c   : > { %v368_v46 = vpop.permute.xlu1 %367 }
 0x26d   : > { %882 = vpow2.f32 %v376_v45  ;;  %v373_v47 = vsub.f32 %v821_v13, %v368_v46 }
 0x26e   : > { %v879_v48 = vpop.eup %878 }
 0x26f   : > { %v380_v49 = vmul.f32 1.442695, %v373_v47  ;;  %v390_v50 = vsel %vm239_vm0, %v879_v48, 0.0 }
 0x270   : > { %391 = vadd.xlane.f32.xlu1 %v390_v50  ;;  %v445_v51 = vpop.permute.xlu1 %444 }
 0x271   : > { %884 = vpow2.f32 %v380_v49  ;;  %829 = vmatprep.subr.msk.bf16.mxu1 %vm452_vm3, %v445_v51  ;;  %v454_v52 = vsel %vm452_vm3, %v445_v51, 0 }
 0x272   : > { %823 = vmatpush3.bf16.msra.mxu1 %v454_v52  ;;  %886 = vpow2.f32 %v342_v59 }
 0x273   : > { %888 = vpow2.f32 %v344_v62 }
 0x274   : > { %890 = vpow2.f32 %v346_v63 }
 0x275   : > { %892 = vpow2.f32 %v348_v0 }
 0x276   : > { %v881_v53 = vpop.eup %880 }
 0x277   : > { %v396_v54 = vsel %vm239_vm0, %v881_v53, 0.0 }
 0x278   : > { %397 = vadd.xlane.f32.xlu1 %v396_v54 }
 0x27a   : > { %v883_v55 = vpop.eup %882 }
 0x27b   : > { %v393_v56 = vsel %vm239_vm0, %v883_v55, 0.0  ;;  %v439_v57 = vpack.c.bf16 %v883_v55, %v879_v48 }
 0x27c   : > { %394 = vadd.xlane.f32.xlu0 %v393_v56 }
 0x27d   : > { %824 = vmatprep.mubr.msk.bf16.mxu1 %vm239_vm0, %v439_v57 }
 0x27e   : > { %v885_v58 = vpop.eup %884 }
 0x27f   : > { %v399_v60 = vsel %vm239_vm0, %v885_v58, 0.0  ;;  %v440_v61 = vpack.c.bf16 %v885_v58, %v881_v53  ;;  %v887_v1 = vpop.eup %886 }
 0x280   : > { %400 = vadd.xlane.f32.xlu1 %v399_v60  ;;  %v889_v2 = vpop.eup %888  ;;  %v386_v6 = vmul.f32 %v887_v1, %v382_v5 }
 0x281   : > { %825 = vmatmul.mubr.msk.bf16.vlgmr.msra.gmra.mxu1 %vm239_vm0, %v440_v61  ;;  %v891_v3 = vpop.eup %890  ;;  %v387_v15 = vmul.f32 %v889_v2, %v383_v12 }
 0x282   : > { %v893_v4 = vpop.eup %892  ;;  %v388_v10 = vmul.f32 %v891_v3, %v384_v9 }
 0x283   : > { %v389_v19 = vmul.f32 %v893_v4, %v385_v17 }
 0x291   : > { %417 = vperm.xlu1 %861, %v887_v1  }
 0x292   : > { %422 = vperm.xlu0 %860, %v889_v2  }
 0x295   : > { %427 = vperm.xlu1 %861, %v891_v3  }
 0x299   : > { %432 = vperm.xlu1 %861, %v893_v4  }
 0x2f9   : > { %v392_v7 = vpop.xlane.xlu1 %391 }
 0x2fa   : > { %v402_v8 = vadd.f32 %v392_v7, %v386_v6 }
 0x2fc   : > { %407 = vst.msk [vmem:[#allocation4] sm:$0xff] %vm230_vm2, %v402_v8 }
 0x301   : > { %v398_v11 = vpop.xlane.xlu1 %397 }
 0x302   : > { %v404_v13 = vadd.f32 %v398_v11, %v388_v10 }
 0x303   : > { %v524_v14 = vld [vmem:[#allocation4] sm:$0xff] }
 0x304   : > { %409 = vst.msk [vmem:[#allocation4 + $0x10] sm:$0xff] %vm230_vm2, %v404_v13  ;;  %894 = vrcp.f32 %v524_v14 }
 0x305   : > { %v395_v16 = vpop.xlane.xlu0 %394 }
 0x306   : > { %v403_v18 = vadd.f32 %v395_v16, %v387_v15 }
 0x308   : > { %408 = vst.msk [vmem:[#allocation4 + $0x8] sm:$0xff] %vm230_vm2, %v403_v18 }
 0x309   : > { %v401_v20 = vpop.xlane.xlu1 %400 }
 0x30a   : > { %v405_v21 = vadd.f32 %v401_v20, %v389_v19 }
 0x30b   : > { %v526_v22 = vld [vmem:[#allocation4 + $0x10] sm:$0xff] }
 0x30c   : > { %410 = vst.msk [vmem:[#allocation4 + $0x18] sm:$0xff] %vm230_vm2, %v405_v21  ;;  %896 = vrcp.f32 %v526_v22 }
 0x30d   : > { %v418_v29 = vpop.permute.xlu1 %417  ;;  %v423_v40 = vpop.permute.xlu0 %422 }
 0x30e   : > { %v435_v37 = vmul.f32 %v418_v29, %v411_v32  ;;  %v436_v45 = vmul.f32 %v423_v40, %v412_v39 }
 0x30f   : > { %v525_v23 = vld [vmem:[#allocation4 + $0x8] sm:$0xff] }
 0x310   : > { %898 = vrcp.f32 %v525_v23 }
 0x311   : > { %v895_v24 = vpop.eup %894  ;;  %v428_v30 = vpop.permute.xlu1 %427 }
 0x312   : > { %534 = vperm.xlu0 %860, %v895_v24   ;;  %v437_v33 = vmul.f32 %v428_v30, %v413_v31 }
 0x313   : > { %v527_v25 = vld [vmem:[#allocation4 + $0x18] sm:$0xff] }
 0x314   : > { %900 = vrcp.f32 %v527_v25 }
 0x315   : > { %v433_v35 = vpop.permute.xlu1 %432 }
 0x316   : > { %v438_v42 = vmul.f32 %v433_v35, %v414_v34 }
 0x319   : > { %v897_v26 = vpop.eup %896 }
 0x31a   : > { %544 = vperm.xlu0 %860, %v897_v26  }
 0x31d   : > { %v899_v27 = vpop.eup %898 }
 0x31e   : > { %539 = vperm.xlu1 %861, %v899_v27  }
 0x321   : > { %v901_v28 = vpop.eup %900 }
 0x322   : > { %549 = vperm.xlu1 %861, %v901_v28  }
 0x341   : > { %v826_v36 = vpop.f32.mrf.mxu1 }
 0x342   : > { %v507_v38 = vadd.f32 %v826_v36, %v437_v33 }
 0x343   : > { %v490_v41 = vpop.f32.mrf.mxu1 }
 0x344   : > { %511 = vst.msk [vmem:[#allocation5 + $0x10] sm:$0xff] %vm239_vm0, %v507_v38  ;;  %v505_v43 = vadd.f32 %v490_v41, %v435_v37 }
 0x345   : > { %v827_v44 = vpop.f32.mrf.mxu1 }
 0x346   : > { %509 = vst.msk [vmem:[#allocation5] sm:$0xff] %vm239_vm0, %v505_v43  ;;  %v508_v46 = vadd.f32 %v827_v44, %v438_v42 }
 0x347   : > { %v493_v47 = vpop.f32.mrf.mxu1 }
 0x348   : > { %512 = vst.msk [vmem:[#allocation5 + $0x18] sm:$0xff] %vm239_vm0, %v508_v46  ;;  %v506_v48 = vadd.f32 %v493_v47, %v436_v45 }
 0x34a   : > { %510 = vst.msk [vmem:[#allocation5 + $0x8] sm:$0xff] %vm239_vm0, %v506_v48 }
 0x34b   : > { %v522_v57 = vld [vmem:[#allocation5 + $0x10] sm:$0xff] }
 0x34d   : > { %v520_v50 = vld [vmem:[#allocation5] sm:$0xff] }
 0x34f   : > { %v523_v58 = vld [vmem:[#allocation5 + $0x18] sm:$0xff] }
 0x351   : > { %v521_v52 = vld [vmem:[#allocation5 + $0x8] sm:$0xff] }
 0x38d   : > { %v535_v49 = vpop.permute.xlu0 %534 }
 0x38e   : > { %v552_v53 = vmul.f32 %v535_v49, %v520_v50 }
 0x395   : > { %v545_v55 = vpop.permute.xlu0 %544 }
 0x396   : > { %v554_v60 = vmul.f32 %v545_v55, %v522_v57 }
 0x399   : > { %v540_v51 = vpop.permute.xlu1 %539 }
 0x39a   : > { %v553_v54 = vmul.f32 %v540_v51, %v521_v52 }
 0x39c   : > { %v862_v56 = vpack.i.bf16 %v553_v54, %v552_v53 }
 0x39d   : > { %v550_v59 = vpop.permute.xlu1 %549 }
 0x39e   : > { %v555_v61 = vmul.f32 %v550_v59, %v523_v58  ;;  %863 = vxpose.xlu0.b32.start.end [1/1] (short) (narrow) %v862_v56, 8 }
 0x3a0   : > { %v869_v62 = vpack.i.bf16 %v555_v61, %v554_v60 }
 0x3a2   : > { %870 = vxpose.xlu1.b32.start.end [1/1] (short) (narrow) %v869_v62, 8 }
 0x41a   : > { %v864_v63 = vpop.trf.xlu0 }
 0x41b   : > { %v868_v0 = vunpack.i.h.bf16 %v864_v63  ;;  %v865_v1 = vunpack.i.l.bf16 %v864_v63 }
 0x41d   : > { %v685_v2 = vpack.c.bf16 %v868_v0, %v868_v0  ;;  %v684_v3 = vpack.c.bf16 %v865_v1, %v865_v1 }
 0x41e   : > { %v871_v4 = vpop.trf.xlu1 }
 0x41f   : > { %v875_v5 = vunpack.i.h.bf16 %v871_v4  ;;  %v872_v6 = vunpack.i.l.bf16 %v871_v4  ;;  %690 = vst.msk [vmem:[%s206_s26 + $0x4] sm:$0xf] %vm215_vm1, %v685_v2  ;;  %689 = vst.msk [vmem:[%s206_s26] sm:$0xf] %vm215_vm1, %v684_v3 }
 0x421   : > { %v687_v7 = vpack.c.bf16 %v875_v5, %v875_v5  ;;  %v686_v8 = vpack.c.bf16 %v872_v6, %v872_v6 }
 0x423   : > { %692 = vst.msk [vmem:[%s206_s26 + $0xc] sm:$0xf] %vm215_vm1, %v687_v7  ;;  %691 = vst.msk [vmem:[%s206_s26 + $0x8] sm:$0xf] %vm215_vm1, %v686_v8 }
 0x424 PF: > { %s12_s11 = sadd.s32 1, %s924_s11   ;;  %s1048_s9 = smov %s920_s10 }
 0x425   : > { %p9_p5 = scmp.ge.s32.totalorder %s12_s11, 4   ;;  %s1049_s10 = smov %s1051_s12 }
 0x427   :  { %11 = sbr.rel (!%p9_p5) target bundleno = 2 (0x2), region = 69 }

</bundles_post_ra>
